<compile_context>
chip_gen: v5e
topology: v5e:2x2
jax: 0.10.0
libtpu: 0.0.40
codegen_flags: <defaults>
</compile_context>

<pallas_src>
import jax
import jax.numpy as jnp
from jax.experimental import pallas as pl
from jax.experimental.pallas import tpu as pltpu

NUM_LAYERS = 2          # number of ResidualBlocks
HIDDEN = 10             # hidden_neurons (logical)
HIDDEN_PAD = 16         # padded to 2 full sublane tiles
OUT = 8                 # output_size (exactly one sublane tile)


def epinet_kernel(t_ref,
                  w0_ref, b0_ref,
                  w1a_ref, b1a_ref, w1b_ref, b1b_ref,
                  w2a_ref, b2a_ref, w2b_ref, b2b_ref,
                  wo_ref, bo_ref,
                  o_ref):
    t = t_ref[...]                                           # (1, N_tile)

    # Input linear + tanh: K=1 contraction -> VPU broadcast FMA (no MXU push).
    h = jnp.tanh(w0_ref[...] * t + b0_ref[...])              # (H_PAD, N_tile)

    # Residual block 1: tanh(x + W1b tanh(W1a x + b1a) + b1b)
    z = jnp.tanh(jnp.dot(w1a_ref[...], h,
                         preferred_element_type=jnp.float32) + b1a_ref[...])
    z = jnp.dot(w1b_ref[...], z,
                preferred_element_type=jnp.float32) + b1b_ref[...]
    h = jnp.tanh(h + z)

    # Residual block 2
    z = jnp.tanh(jnp.dot(w2a_ref[...], h,
                         preferred_element_type=jnp.float32) + b2a_ref[...])
    z = jnp.dot(w2b_ref[...], z,
                preferred_element_type=jnp.float32) + b2b_ref[...]
    h = jnp.tanh(h + z)

    # Output linear + sigmoid, stored lane-dense as (OUT, N_tile).
    y = jnp.dot(wo_ref[...], h,
                preferred_element_type=jnp.float32) + bo_ref[...]
    o_ref[...] = jax.nn.sigmoid(y)


def epinet_forward(t, params, n_tile=4096):
    """t: (N, 1) float32; params: 12 padded arrays. Returns (N, OUT) float32."""
    n = t.shape[0]

    # Lane-align / tile the batch dimension (tile always a multiple of 128).
    n_tile = max(128, (n_tile // 128) * 128)
    n_aligned = max(128, pl.cdiv(n, 128) * 128)
    if n_aligned <= n_tile:
        tile = n_aligned
        n_pad = n_aligned
    else:
        tile = n_tile
        n_pad = pl.cdiv(n, tile) * tile

    # (N, 1) -> (1, N_pad): batch on the lane axis, zero-padded tail.
    t_row = t.reshape(1, n)
    if n_pad != n:
        t_row = jnp.pad(t_row, ((0, 0), (0, n_pad - n)))

    grid = (n_pad // tile,)

    # Weights/biases: full-array blocks with a constant index_map -> resident
    # in VMEM across the whole grid (no per-step DMA).
    const_specs = [pl.BlockSpec(p.shape, lambda i: (0, 0)) for p in params]

    out_padded = pl.pallas_call(
        epinet_kernel,
        out_shape=jax.ShapeDtypeStruct((OUT, n_pad), jnp.float32),
        grid=grid,
        in_specs=[pl.BlockSpec((1, tile), lambda i: (0, i))] + const_specs,
        out_specs=pl.BlockSpec((OUT, tile), lambda i: (0, i)),
        compiler_params=pltpu.CompilerParams(
            dimension_semantics=("parallel",)),
    )(t_row, *params)

    # Back to the module's (N, OUT) convention (cheap layout plumbing).
    return out_padded[:, :n].T


def make_params(key):
    """Xavier-normal (gain=tanh) weights in PyTorch (out, in) layout, bias=0.01,
    zero-padded to HIDDEN_PAD so the padded rows/cols contribute exactly 0."""
    gain = 5.0 / 3.0  # nn.init.calculate_gain('tanh')
    keys = jax.random.split(key, 6)

    def linear(k, fan_in, fan_out, pad_in, pad_out):
        std = gain * jnp.sqrt(2.0 / (fan_in + fan_out))
        w = std * jax.random.normal(k, (fan_out, fan_in), dtype=jnp.float32)
        w_pad = jnp.zeros((pad_out, pad_in), jnp.float32).at[:fan_out, :fan_in].set(w)
        b_pad = jnp.zeros((pad_out, 1), jnp.float32).at[:fan_out, :].set(0.01)
        return w_pad, b_pad

    w0, b0 = linear(keys[0], 1, HIDDEN, 1, HIDDEN_PAD)            # (16, 1)
    w1a, b1a = linear(keys[1], HIDDEN, HIDDEN, HIDDEN_PAD, HIDDEN_PAD)
    w1b, b1b = linear(keys[2], HIDDEN, HIDDEN, HIDDEN_PAD, HIDDEN_PAD)
    w2a, b2a = linear(keys[3], HIDDEN, HIDDEN, HIDDEN_PAD, HIDDEN_PAD)
    w2b, b2b = linear(keys[4], HIDDEN, HIDDEN, HIDDEN_PAD, HIDDEN_PAD)
    wo, bo = linear(keys[5], HIDDEN, OUT, HIDDEN_PAD, OUT)         # (8, 16)
    return [w0, b0, w1a, b1a, w1b, b1b, w2a, b2a, w2b, b2b, wo, bo]


def reference_forward(t, p):
    """Pure-JAX reference in the standard (N, features) layout, using the
    unpadded slices of the padded parameters."""
    w0, b0, w1a, b1a, w1b, b1b, w2a, b2a, w2b, b2b, wo, bo = p

    def lin(x, w, b, fi, fo):
        return x @ w[:fo, :fi].T + b[:fo, 0]

    h = jnp.tanh(lin(t, w0, b0, 1, HIDDEN))
    h = jnp.tanh(h + lin(jnp.tanh(lin(h, w1a, b1a, HIDDEN, HIDDEN)),
                         w1b, b1b, HIDDEN, HIDDEN))
    h = jnp.tanh(h + lin(jnp.tanh(lin(h, w2a, b2a, HIDDEN, HIDDEN)),
                         w2b, b2b, HIDDEN, HIDDEN))
    return jax.nn.sigmoid(lin(h, wo, bo, HIDDEN, OUT))


if __name__ == "__main__":
    key = jax.random.PRNGKey(0)
    pkey, tkey = jax.random.split(key)

    params = make_params(pkey)

    # Time-like scalar inputs, shape (N, 1) — matches EpiNet's Linear(1, hidden).
    # N deliberately not a multiple of 128 and tile forced small so the
    # padding + multi-tile grid (multi-core) path is exercised.
    N = 300
    t = jax.random.uniform(tkey, (N, 1), dtype=jnp.float32)

    out = epinet_forward(t, params, n_tile=256)
    out = jax.block_until_ready(out)

    ref = reference_forward(t, params)
    assert out.shape == (N, OUT), out.shape
    assert jnp.allclose(out, ref, atol=1e-4, rtol=1e-4), "mismatch vs reference"

    print("KERNEL_OK")
</pallas_src>

<mosaic_0001>
module attributes {stable_mosaic.version = 11 : i64} {
  func.func @epinet_kernel(%arg0: i32, %arg1: memref<1x256xf32, #tpu.memory_space<vmem>>, %arg2: memref<16x1xf32, #tpu.memory_space<vmem>>, %arg3: memref<16x1xf32, #tpu.memory_space<vmem>>, %arg4: memref<16x16xf32, #tpu.memory_space<vmem>>, %arg5: memref<16x1xf32, #tpu.memory_space<vmem>>, %arg6: memref<16x16xf32, #tpu.memory_space<vmem>>, %arg7: memref<16x1xf32, #tpu.memory_space<vmem>>, %arg8: memref<16x16xf32, #tpu.memory_space<vmem>>, %arg9: memref<16x1xf32, #tpu.memory_space<vmem>>, %arg10: memref<16x16xf32, #tpu.memory_space<vmem>>, %arg11: memref<16x1xf32, #tpu.memory_space<vmem>>, %arg12: memref<8x16xf32, #tpu.memory_space<vmem>>, %arg13: memref<8x1xf32, #tpu.memory_space<vmem>>, %arg14: memref<8x256xf32, #tpu.memory_space<vmem>>) attributes {dimension_semantics = [#tpu.dimension_semantics<parallel>], iteration_bounds = array<i64: 2>, scalar_prefetch = 0 : i64, scratch_operands = 0 : i64, tpu.core_type = #tpu.core_type<tc>, window_params = [{transform_indices = @transform_0, window_bounds = array<i64: 1, 256>}, {pipeline_mode = #tpu.pipeline_mode<synchronous>, transform_indices = @transform_1, window_bounds = array<i64: 16, 1>}, {pipeline_mode = #tpu.pipeline_mode<synchronous>, transform_indices = @transform_2, window_bounds = array<i64: 16, 1>}, {pipeline_mode = #tpu.pipeline_mode<synchronous>, transform_indices = @transform_3, window_bounds = array<i64: 16, 16>}, {pipeline_mode = #tpu.pipeline_mode<synchronous>, transform_indices = @transform_4, window_bounds = array<i64: 16, 1>}, {pipeline_mode = #tpu.pipeline_mode<synchronous>, transform_indices = @transform_5, window_bounds = array<i64: 16, 16>}, {pipeline_mode = #tpu.pipeline_mode<synchronous>, transform_indices = @transform_6, window_bounds = array<i64: 16, 1>}, {pipeline_mode = #tpu.pipeline_mode<synchronous>, transform_indices = @transform_7, window_bounds = array<i64: 16, 16>}, {pipeline_mode = #tpu.pipeline_mode<synchronous>, transform_indices = @transform_8, window_bounds = array<i64: 16, 1>}, {pipeline_mode = #tpu.pipeline_mode<synchronous>, transform_indices = @transform_9, window_bounds = array<i64: 16, 16>}, {pipeline_mode = #tpu.pipeline_mode<synchronous>, transform_indices = @transform_10, window_bounds = array<i64: 16, 1>}, {pipeline_mode = #tpu.pipeline_mode<synchronous>, transform_indices = @transform_11, window_bounds = array<i64: 8, 16>}, {pipeline_mode = #tpu.pipeline_mode<synchronous>, transform_indices = @transform_12, window_bounds = array<i64: 8, 1>}, {transform_indices = @transform_13, window_bounds = array<i64: 8, 256>}]} {
    %c0 = arith.constant 0 : index
    %c0_0 = arith.constant 0 : index
    %0 = vector.load %arg1[%c0, %c0_0] : memref<1x256xf32, #tpu.memory_space<vmem>>, vector<1x256xf32>
    %c0_1 = arith.constant 0 : index
    %c0_2 = arith.constant 0 : index
    %1 = vector.load %arg2[%c0_1, %c0_2] : memref<16x1xf32, #tpu.memory_space<vmem>>, vector<16x1xf32>
    %2 = vector.broadcast %1 : vector<16x1xf32> to vector<16x256xf32>
    %3 = vector.broadcast %0 : vector<1x256xf32> to vector<16x256xf32>
    %4 = arith.mulf %2, %3 : vector<16x256xf32>
    %c0_3 = arith.constant 0 : index
    %c0_4 = arith.constant 0 : index
    %5 = vector.load %arg3[%c0_3, %c0_4] : memref<16x1xf32, #tpu.memory_space<vmem>>, vector<16x1xf32>
    %6 = vector.broadcast %5 : vector<16x1xf32> to vector<16x256xf32>
    %7 = arith.addf %4, %6 : vector<16x256xf32>
    %8 = math.tanh %7 : vector<16x256xf32>
    %c0_5 = arith.constant 0 : index
    %c0_6 = arith.constant 0 : index
    %9 = vector.load %arg4[%c0_5, %c0_6] : memref<16x16xf32, #tpu.memory_space<vmem>>, vector<16x16xf32>
    %cst = arith.constant dense<0.000000e+00> : vector<16x256xf32>
    %10 = tpu.matmul %9, %8, %cst {dimension_numbers = #tpu.dot_dimension_numbers<[1], [0], [0], [1], [0, 0, 1, 1], [], []>} : vector<16x16xf32>, vector<16x256xf32>, vector<16x256xf32> -> vector<16x256xf32>
    %c0_7 = arith.constant 0 : index
    %c0_8 = arith.constant 0 : index
    %11 = vector.load %arg5[%c0_7, %c0_8] : memref<16x1xf32, #tpu.memory_space<vmem>>, vector<16x1xf32>
    %12 = vector.broadcast %11 : vector<16x1xf32> to vector<16x256xf32>
    %13 = arith.addf %10, %12 : vector<16x256xf32>
    %14 = math.tanh %13 : vector<16x256xf32>
    %c0_9 = arith.constant 0 : index
    %c0_10 = arith.constant 0 : index
    %15 = vector.load %arg6[%c0_9, %c0_10] : memref<16x16xf32, #tpu.memory_space<vmem>>, vector<16x16xf32>
    %cst_11 = arith.constant dense<0.000000e+00> : vector<16x256xf32>
    %16 = tpu.matmul %15, %14, %cst_11 {dimension_numbers = #tpu.dot_dimension_numbers<[1], [0], [0], [1], [0, 0, 1, 1], [], []>} : vector<16x16xf32>, vector<16x256xf32>, vector<16x256xf32> -> vector<16x256xf32>
    %c0_12 = arith.constant 0 : index
    %c0_13 = arith.constant 0 : index
    %17 = vector.load %arg7[%c0_12, %c0_13] : memref<16x1xf32, #tpu.memory_space<vmem>>, vector<16x1xf32>
    %18 = vector.broadcast %17 : vector<16x1xf32> to vector<16x256xf32>
    %19 = arith.addf %16, %18 : vector<16x256xf32>
    %20 = arith.addf %8, %19 : vector<16x256xf32>
    %21 = math.tanh %20 : vector<16x256xf32>
    %c0_14 = arith.constant 0 : index
    %c0_15 = arith.constant 0 : index
    %22 = vector.load %arg8[%c0_14, %c0_15] : memref<16x16xf32, #tpu.memory_space<vmem>>, vector<16x16xf32>
    %cst_16 = arith.constant dense<0.000000e+00> : vector<16x256xf32>
    %23 = tpu.matmul %22, %21, %cst_16 {dimension_numbers = #tpu.dot_dimension_numbers<[1], [0], [0], [1], [0, 0, 1, 1], [], []>} : vector<16x16xf32>, vector<16x256xf32>, vector<16x256xf32> -> vector<16x256xf32>
    %c0_17 = arith.constant 0 : index
    %c0_18 = arith.constant 0 : index
    %24 = vector.load %arg9[%c0_17, %c0_18] : memref<16x1xf32, #tpu.memory_space<vmem>>, vector<16x1xf32>
    %25 = vector.broadcast %24 : vector<16x1xf32> to vector<16x256xf32>
    %26 = arith.addf %23, %25 : vector<16x256xf32>
    %27 = math.tanh %26 : vector<16x256xf32>
    %c0_19 = arith.constant 0 : index
    %c0_20 = arith.constant 0 : index
    %28 = vector.load %arg10[%c0_19, %c0_20] : memref<16x16xf32, #tpu.memory_space<vmem>>, vector<16x16xf32>
    %cst_21 = arith.constant dense<0.000000e+00> : vector<16x256xf32>
    %29 = tpu.matmul %28, %27, %cst_21 {dimension_numbers = #tpu.dot_dimension_numbers<[1], [0], [0], [1], [0, 0, 1, 1], [], []>} : vector<16x16xf32>, vector<16x256xf32>, vector<16x256xf32> -> vector<16x256xf32>
    %c0_22 = arith.constant 0 : index
    %c0_23 = arith.constant 0 : index
    %30 = vector.load %arg11[%c0_22, %c0_23] : memref<16x1xf32, #tpu.memory_space<vmem>>, vector<16x1xf32>
    %31 = vector.broadcast %30 : vector<16x1xf32> to vector<16x256xf32>
    %32 = arith.addf %29, %31 : vector<16x256xf32>
    %33 = arith.addf %21, %32 : vector<16x256xf32>
    %34 = math.tanh %33 : vector<16x256xf32>
    %c0_24 = arith.constant 0 : index
    %c0_25 = arith.constant 0 : index
    %35 = vector.load %arg12[%c0_24, %c0_25] : memref<8x16xf32, #tpu.memory_space<vmem>>, vector<8x16xf32>
    %cst_26 = arith.constant dense<0.000000e+00> : vector<8x256xf32>
    %36 = tpu.matmul %35, %34, %cst_26 {dimension_numbers = #tpu.dot_dimension_numbers<[1], [0], [0], [1], [0, 0, 1, 1], [], []>} : vector<8x16xf32>, vector<16x256xf32>, vector<8x256xf32> -> vector<8x256xf32>
    %c0_27 = arith.constant 0 : index
    %c0_28 = arith.constant 0 : index
    %37 = vector.load %arg13[%c0_27, %c0_28] : memref<8x1xf32, #tpu.memory_space<vmem>>, vector<8x1xf32>
    %38 = vector.broadcast %37 : vector<8x1xf32> to vector<8x256xf32>
    %39 = arith.addf %36, %38 : vector<8x256xf32>
    %40 = arith.negf %39 : vector<8x256xf32>
    %41 = math.exp %40 : vector<8x256xf32>
    %cst_29 = arith.constant 1.000000e+00 : f32
    %42 = vector.broadcast %cst_29 : f32 to vector<8x256xf32>
    %43 = arith.addf %42, %41 : vector<8x256xf32>
    %44 = arith.divf %42, %43 : vector<8x256xf32>
    %c0_30 = arith.constant 0 : index
    %c0_31 = arith.constant 0 : index
    %45 = vector.load %arg14[%c0_30, %c0_31] : memref<8x256xf32, #tpu.memory_space<vmem>>, vector<8x256xf32>
    tpu.vector_store %arg14[%c0_30, %c0_31], %44 {strides = array<i32>} : memref<8x256xf32, #tpu.memory_space<vmem>>, vector<8x256xf32>,
    return
  }
  func.func @transform_0(%arg0: i32) -> (i32, i32) {
    %c0_i32 = arith.constant 0 : i32
    %c0_i32_0 = arith.constant 0 : i32
    return %c0_i32, %arg0 : i32, i32
  }
  func.func @transform_1(%arg0: i32) -> (i32, i32) {
    %c0_i32 = arith.constant 0 : i32
    %c0_i32_0 = arith.constant 0 : i32
    %c0_i32_1 = arith.constant 0 : i32
    return %c0_i32, %c0_i32_0 : i32, i32
  }
  func.func @transform_2(%arg0: i32) -> (i32, i32) {
    %c0_i32 = arith.constant 0 : i32
    %c0_i32_0 = arith.constant 0 : i32
    %c0_i32_1 = arith.constant 0 : i32
    return %c0_i32, %c0_i32_0 : i32, i32
  }
  func.func @transform_3(%arg0: i32) -> (i32, i32) {
    %c0_i32 = arith.constant 0 : i32
    %c0_i32_0 = arith.constant 0 : i32
    %c0_i32_1 = arith.constant 0 : i32
    return %c0_i32, %c0_i32_0 : i32, i32
  }
  func.func @transform_4(%arg0: i32) -> (i32, i32) {
    %c0_i32 = arith.constant 0 : i32
    %c0_i32_0 = arith.constant 0 : i32
    %c0_i32_1 = arith.constant 0 : i32
    return %c0_i32, %c0_i32_0 : i32, i32
  }
  func.func @transform_5(%arg0: i32) -> (i32, i32) {
    %c0_i32 = arith.constant 0 : i32
    %c0_i32_0 = arith.constant 0 : i32
    %c0_i32_1 = arith.constant 0 : i32
    return %c0_i32, %c0_i32_0 : i32, i32
  }
  func.func @transform_6(%arg0: i32) -> (i32, i32) {
    %c0_i32 = arith.constant 0 : i32
    %c0_i32_0 = arith.constant 0 : i32
    %c0_i32_1 = arith.constant 0 : i32
    return %c0_i32, %c0_i32_0 : i32, i32
  }
  func.func @transform_7(%arg0: i32) -> (i32, i32) {
    %c0_i32 = arith.constant 0 : i32
    %c0_i32_0 = arith.constant 0 : i32
    %c0_i32_1 = arith.constant 0 : i32
    return %c0_i32, %c0_i32_0 : i32, i32
  }
  func.func @transform_8(%arg0: i32) -> (i32, i32) {
    %c0_i32 = arith.constant 0 : i32
    %c0_i32_0 = arith.constant 0 : i32
    %c0_i32_1 = arith.constant 0 : i32
    return %c0_i32, %c0_i32_0 : i32, i32
  }
  func.func @transform_9(%arg0: i32) -> (i32, i32) {
    %c0_i32 = arith.constant 0 : i32
    %c0_i32_0 = arith.constant 0 : i32
    %c0_i32_1 = arith.constant 0 : i32
    return %c0_i32, %c0_i32_0 : i32, i32
  }
  func.func @transform_10(%arg0: i32) -> (i32, i32) {
    %c0_i32 = arith.constant 0 : i32
    %c0_i32_0 = arith.constant 0 : i32
    %c0_i32_1 = arith.constant 0 : i32
    return %c0_i32, %c0_i32_0 : i32, i32
  }
  func.func @transform_11(%arg0: i32) -> (i32, i32) {
    %c0_i32 = arith.constant 0 : i32
    %c0_i32_0 = arith.constant 0 : i32
    %c0_i32_1 = arith.constant 0 : i32
    return %c0_i32, %c0_i32_0 : i32, i32
  }
  func.func @transform_12(%arg0: i32) -> (i32, i32) {
    %c0_i32 = arith.constant 0 : i32
    %c0_i32_0 = arith.constant 0 : i32
    %c0_i32_1 = arith.constant 0 : i32
    return %c0_i32, %c0_i32_0 : i32, i32
  }
  func.func @transform_13(%arg0: i32) -> (i32, i32) {
    %c0_i32 = arith.constant 0 : i32
    %c0_i32_0 = arith.constant 0 : i32
    return %c0_i32, %arg0 : i32, i32
  }
}

</mosaic_0001>

<bundles_post_ra>
// kernel: tpu_custom_call.1
= control target key start
LH: loop header
LB: loop body
LE: loop exit
PB: predicated region body
PF: predicated region fallthrough
CT: control target
= control target key end

     0   :  { %s1363_s0 = inlined_call_operand.vmem [shape: f32[1,512], index: 0, kind: input, shape index: {}]   ;;  %s1364_s1 = inlined_call_operand.vmem [shape: f32[16,1], index: 1, kind: input, shape index: {}]   ;;  %s1365_s2 = inlined_call_operand.vmem [shape: f32[16,1], index: 2, kind: input, shape index: {}]   ;;  %s1366_s3 = inlined_call_operand.vmem [shape: f32[16,16], index: 3, kind: input, shape index: {}]   ;;  %s1367_s4 = inlined_call_operand.vmem [shape: f32[16,1], index: 4, kind: input, shape index: {}]   ;;  %s1368_s5 = inlined_call_operand.vmem [shape: f32[16,16], index: 5, kind: input, shape index: {}]   ;;  %s1369_s6 = inlined_call_operand.vmem [shape: f32[16,1], index: 6, kind: input, shape index: {}]   ;;  %s1370_s7 = inlined_call_operand.vmem [shape: f32[16,16], index: 7, kind: input, shape index: {}]   ;;  %s1371_s8 = inlined_call_operand.vmem [shape: f32[16,1], index: 8, kind: input, shape index: {}]   ;;  %s1372_s9 = inlined_call_operand.vmem [shape: f32[16,16], index: 9, kind: input, shape index: {}]   ;;  %s1373_s10 = inlined_call_operand.vmem [shape: f32[16,1], index: 10, kind: input, shape index: {}]   ;;  %s1374_s11 = inlined_call_operand.vmem [shape: f32[8,16], index: 11, kind: input, shape index: {}]   ;;  %s1375_s12 = inlined_call_operand.vmem [shape: f32[8,1], index: 12, kind: input, shape index: {}]   ;;  %s1376_s13 = inlined_call_operand.hbm [shape: f32[8,512], index: 13, kind: output, shape index: {}]  }
   0x1   :  { %1378 = sst [smem:[#allocation7_spill]] %s1363_s0 }
   0x2   :  { %18 = vsyncpa [#allocation3], 0 }
   0x3   :  { %20 = vsyncpa [#allocation3 + $0x1], 0  ;;  %s1191_s25 = smov 0   ;;  %s1193_s26 = smov 0  }
   0x4   :  { %s1195_s27 = smov 0   ;;  %s1197_s28 = smov 0  }
   0x5 LB: > { %1379 = sst [smem:[#allocation5_spill]] %s1114_s27  ;;  %s1212_s29 = sadd.s32 4294967295, %s1118_s28   ;;  %s1118_s28 = sphi %s1197_s28, %s1388_s28   ;;  %s1114_s27 = sphi %s1195_s27, %s1385_s27   ;;  %s1110_s26 = sphi %s1193_s26, %s1387_s26   ;;  %s1106_s25 = sphi %s1191_s25, %s1386_s25  }
   0x6   : > { %s933_s30 = sadd.s32 4294967294, %s1118_s28   ;;  %s1216_s14 = sadd.s32 1, %s1118_s28  }
   0x7   : > { %s311_s15 = sadd.s32 1, %s1114_s27  ;;  %s308_s16 = ssub.s32 %s1118_s28, %s1216_s14 }
   0x8   : > { %p321_p0 = scmp.ne.s32.totalorder %s1114_s27, %s1110_s26  ;;  %p309_p1 = scmp.eq.s32.totalorder %s308_s16, 0 }
   0x9   : > { %p322_p2 = scmp.eq.s32.totalorder %s1212_s29, 1  ;;  %p327_p3 = scmp.ne.s32.totalorder %s1110_s26, %s1106_s25 }
   0xa   : > { %p328_p4 = scmp.eq.s32.totalorder %s933_s30, 1  ;;  %p936_p7 = scmp.ge.s32.totalorder %s1118_s28, 1 }
   0xb   : > { %s1227_s17 = scalar_select %p309_p1, %s1114_s27, %s311_s15  }
   0xc   : > { %p1229_p5 = por %p322_p2, %p321_p0  ;;  %p1233_p6 = por %p328_p4, %p327_p3 }
   0xd   : > { %1380 = sst [smem:[#allocation6_spill]] %s1227_s17  ;;  %p390_p8 = scmp.lt.s32.totalorder %s1118_s28, 3 }
   0xf   : > { %p391_p9 = pnand %p936_p7, %p390_p8 }
  0x10   : > { %s938_s20 = sshll.u32 (!%p391_p9), %s1212_s29, 1  ;;  %s1383_s0 = sld [smem:[#allocation7_spill]] (!%p391_p9) }
  0x11   : > { %394 = sbr.rel (%p391_p9) target bundleno = 919 (0x397), region = 72  ;;  %p434_p10 = scmp.lt.s32.totalorder (!%p391_p9), %s938_s20, 3 }
  0x12   : > { %s964_s22 = sshll.u32 (!%p391_p9), %s1212_s29, 4  ;;  %s1076_s27 = scalar_lea.hbm (!%p391_p9), %s1376_s13, 32 }
  0x13   : > { %s872_s17 = scalar_lea.hbm (!%p391_p9), %s1376_s13, %s964_s22 }
  0x14   : > { %s876_s29 = sshll.u32 (!%p391_p9), %s872_s17, 4  ;;  %s877_s29 = int_to_ptr.hbm [resolvable:$true] %s876_s29 }
  0x15   : > { %s1070_s16 = sshra.s32 (!%p391_p9), %s877_s29, 4  ;;  %s1071_s16 = int_to_ptr.hbm [resolvable:$true] %s1070_s16 }
  0x16   : > { %v462_v0 = vld [vmem:[%s1365_s2 + $0x8] sm:$0xff]  ;;  %v1120_v2 = vmov 0   ;;  %v461_v3 = vld [vmem:[%s1365_s2] sm:$0xff]  ;;  %s1390_s20 = smov (!%p434_p10, %s938_s20), 3  ;;  %vm495_vm0 = vcmask 130048   ;;  %p1077_p0 = scmp.lt.s32.totalorder %s1071_s16, %s1376_s13 }
  0x17   : > { %v441_v1 = vld [vmem:[%s1364_s1 + $0x8] sm:$0xff]  ;;  %1006 = vset.pattern.permute.xlu1 %v1120_v2  ;;  %1005 = vset.pattern.permute.xlu0 %v1120_v2  ;;  %v440_v4 = vld [vmem:[%s1364_s1] sm:$0xff]  ;;  %s436_s23 = scalar_lea.vmem %s1383_s0, %s1390_s20  ;;  %s430_s20 = sand.u32 1, %s1110_s26  }
  0x18   : > { %470 = vperm.xlu1 %1006, %v462_v0   ;;  %449 = vperm.xlu0 %1005, %v441_v1   ;;  %v554_v5 = vld [vmem:[%s1369_s6] sm:$0xff]  ;;  %v555_v6 = vld [vmem:[%s1369_s6 + $0x8] sm:$0xff]  ;;  %s937_s21 = sshll.u32 %s430_s20, 4  ;;  %s861_s15 = scalar_lea.sflag [#allocation3], %s430_s20 }
  0x19   : > { %1007 = vset.pattern.permute.xlu2 %v1120_v2  ;;  %v699_v7 = vld [vmem:[%s1373_s10 + $0x8] sm:$0xff]  ;;  %v628_v8 = vld [vmem:[%s1371_s8] sm:$0xff]  ;;  %s432_s24 = scalar_lea.vmem [#allocation2], %s937_s21  ;;  %s1072_s21 = scalar_lea.hbm %s1071_s16, 16 }
  0x1a   : > { %v771_v9 = vld [vmem:[%s1375_s12] sm:$0xff]  ;;  %v484_v15 = vld [vmem:[%s1367_s4 + $0x8] sm:$0xff]  ;;  %s874_s30 = sshll.u32 %s432_s24, 4  ;;  %p1073_p11 = scmp.ne.s32.totalorder %s1071_s16, %s1072_s21  ;;  %s875_s30 = int_to_ptr.vmem [resolvable:$true] %s874_s30 }
  0x1b   : > { %v439_v10 = vld [vmem:[%s436_s23] sm:$0x3]  ;;  %492 = vperm.xlu2 %1007, %v484_v15   ;;  %v629_v29 = vld [vmem:[%s1371_s8 + $0x8] sm:$0xff]  ;;  %p1078_p1 = scmp.lt.s32.totalorder %s1076_s27, %s1072_s21 }
  0x1c   : > { %v453_v11 = vperm.slane %v439_v10, 0  ;;  %v454_v12 = vperm.slane %v439_v10, 1  ;;  %v483_v20 = vld [vmem:[%s1367_s4] sm:$0xff]  ;;  %v482_v34 = vld [vmem:[%s1366_s3 + $0x8] sm:$0xff]  ;;  %p1074_p12 = pnand %p1073_p11, %p1229_p5 }
  0x1d   : > { %v481_v30 = vld [vmem:[%s1366_s3] sm:$0xff]  ;;  %v553_v50 = vld [vmem:[%s1368_s5 + $0x8] sm:$0xff]  ;;  %p1079_p2 = por %p1078_p1, %p1077_p0 }
  0x1e   : > { %v698_v33 = vld [vmem:[%s1373_s10] sm:$0xff]  ;;  %p1075_p13 = pneg %p1074_p12 }
  0x1f   : > { %v552_v47 = vld [vmem:[%s1368_s5] sm:$0xff] }
  0x20   : > { %465 = vperm.xlu1 %1006, %v461_v3   ;;  %444 = vperm.xlu0 %1005, %v440_v4   ;;  %v626_v3 = vld [vmem:[%s1370_s7] sm:$0xff]  ;;  %p1080_p3 = pnand %p1079_p2, %p1075_p13 }
  0x23   : > { %487 = vperm.xlu2 %1007, %v483_v20  }
  0x28   : > { %558 = vperm.xlu1 %1006, %v554_v5   ;;  %563 = vperm.xlu0 %1005, %v555_v6   ;;  %v627_v6 = vld [vmem:[%s1370_s7 + $0x8] sm:$0xff] }
  0x2b   : > { %637 = vperm.xlu2 %1007, %v629_v29  }
  0x30   : > { %707 = vperm.xlu1 %1006, %v699_v7   ;;  %632 = vperm.xlu0 %1005, %v628_v8  }
  0x33   : > { %702 = vperm.xlu2 %1007, %v698_v33  }
  0x38   : > { %774 = vperm.xlu0 %1005, %v771_v9  }
  0x75   : > { %v493_v35 = vpop.permute.xlu2 %492 }
  0x7d   : > { %v488_v38 = vpop.permute.xlu2 %487 }
  0x85   : > { %v638_v10 = vpop.permute.xlu2 %637 }
  0x8a   : > { %v471_v13 = vpop.permute.xlu1 %470  ;;  %v450_v14 = vpop.permute.xlu0 %449 }
  0x8b   : > { %v459_v16 = vmul.f32 %v453_v11, %v450_v14  ;;  %v460_v17 = vmul.f32 %v454_v12, %v450_v14 }
  0x8d   : > { %v475_v18 = vadd.f32 %v471_v13, %v459_v16  ;;  %v476_v19 = vadd.f32 %v471_v13, %v460_v17 }
  0x8f   : > { %1008 = vtanh.f32 %v475_v18 }
  0x90   : > { %1010 = vtanh.f32 %v476_v19  ;;  %v696_v19 = vld [vmem:[%s1372_s9] sm:$0xff] }
  0x92   : > { %v445_v21 = vpop.permute.xlu0 %444  ;;  %v466_v24 = vpop.permute.xlu1 %465 }
  0x93   : > { %v457_v22 = vmul.f32 %v453_v11, %v445_v21  ;;  %v458_v23 = vmul.f32 %v454_v12, %v445_v21 }
  0x95   : > { %v1009_v25 = vpop.eup %1008  ;;  %v473_v26 = vadd.f32 %v466_v24, %v457_v22  ;;  %v474_v27 = vadd.f32 %v466_v24, %v458_v23  ;;  %v697_v22 = vld [vmem:[%s1372_s9 + $0x8] sm:$0xff] }
  0x96   : > { %v1011_v28 = vpop.eup %1010  ;;  %516 = vmatpush.msra.mxu0 %v1009_v25 }
  0x97   : > { %1012 = vtanh.f32 %v473_v26  ;;  %539 = vmatpush.msra.mxu1 %v1011_v28 }
  0x98   : > { %1014 = vtanh.f32 %v474_v27 }
  0x9a   : > { %v559_v53 = vpop.permute.xlu1 %558  ;;  %v564_v55 = vpop.permute.xlu0 %563 }
  0x9d   : > { %v1013_v31 = vpop.eup %1012 }
  0x9e   : > { %v1015_v32 = vpop.eup %1014  ;;  %517 = vmatpush.msra.mxu0 %v1013_v31 }
  0x9f   : > { %540 = vmatpush.msra.mxu1 %v1015_v32  ;;  %939 = vmatmul.msk.f32.vlgmr.msra.gmra.mxu0 %vm495_vm0, %v481_v30 }
  0xa0   : > { %941 = vmatmul.msk.f32.vlgmr.msra.gmra.mxu1 %vm495_vm0, %v481_v30 }
  0xa2   : > { %v633_v9 = vpop.permute.xlu0 %632  ;;  %v708_v27 = vpop.permute.xlu1 %707 }
  0xa7   : > { %940 = vmatmul.msk.f32.gmra.mxu0 %vm495_vm0, %v482_v34 }
  0xa8   : > { %942 = vmatmul.msk.f32.gmra.mxu1 %vm495_vm0, %v482_v34 }
 0x11c   : > { %v519_v36 = vpop.f32.mrf.mxu0 }
 0x11d   : > { %v542_v37 = vpop.f32.mrf.mxu1  ;;  %v520_v40 = vadd.f32 %v519_v36, %v488_v38 }
 0x11e   : > { %v543_v43 = vadd.f32 %v542_v37, %v488_v38 }
 0x124   : > { %v522_v39 = vpop.f32.mrf.mxu0 }
 0x125   : > { %v523_v41 = vadd.f32 %v522_v39, %v493_v35  ;;  %v545_v42 = vpop.f32.mrf.mxu1  ;;  %v770_v39 = vld [vmem:[%s1374_s11] sm:$0xff] }
 0x126   : > { %v546_v44 = vadd.f32 %v545_v42, %v493_v35  ;;  %v775_v42 = vpop.permute.xlu0 %774 }
 0x127   : > { %1016 = vtanh.f32 %v523_v41 }
 0x128   : > { %1018 = vtanh.f32 %v546_v44 }
 0x129   : > { %1020 = vtanh.f32 %v520_v40 }
 0x12a   : > { %1022 = vtanh.f32 %v543_v43 }
 0x12d   : > { %v1017_v45 = vpop.eup %1016 }
 0x12e   : > { %v1019_v46 = vpop.eup %1018  ;;  %586 = vmatpush.msra.mxu2 %v1017_v45 }
 0x12f   : > { %v1021_v48 = vpop.eup %1020  ;;  %609 = vmatpush.msra.mxu3 %v1019_v46 }
 0x130   : > { %v1023_v49 = vpop.eup %1022  ;;  %587 = vmatpush.msra.mxu2 %v1021_v48 }
 0x131   : > { %610 = vmatpush.msra.mxu3 %v1023_v49  ;;  %943 = vmatmul.msk.f32.vlgmr.msra.gmra.mxu2 %vm495_vm0, %v552_v47 }
 0x132   : > { %945 = vmatmul.msk.f32.vlgmr.msra.gmra.mxu3 %vm495_vm0, %v552_v47 }
 0x139   : > { %944 = vmatmul.msk.f32.gmra.mxu2 %vm495_vm0, %v553_v50 }
 0x13a   : > { %946 = vmatmul.msk.f32.gmra.mxu3 %vm495_vm0, %v553_v50 }
 0x1b4   : > { %v589_v51 = vpop.f32.mrf.mxu2 }
 0x1b5   : > { %v612_v52 = vpop.f32.mrf.mxu3  ;;  %v590_v54 = vadd.f32 %v589_v51, %v559_v53 }
 0x1b6   : > { %v613_v56 = vadd.f32 %v612_v52, %v559_v53 }
 0x1b7   : > { %v618_v61 = vadd.f32 %v1013_v31, %v590_v54 }
 0x1b8   : > { %v619_v63 = vadd.f32 %v1015_v32, %v613_v56 }
 0x1bc   : > { %v592_v57 = vpop.f32.mrf.mxu2 }
 0x1bd   : > { %v593_v58 = vadd.f32 %v592_v57, %v564_v55  ;;  %v615_v59 = vpop.f32.mrf.mxu3 }
 0x1be   : > { %v616_v60 = vadd.f32 %v615_v59, %v564_v55 }
 0x1bf   : > { %v620_v62 = vadd.f32 %v1009_v25, %v593_v58  ;;  %v703_v25 = vpop.permute.xlu2 %702 }
 0x1c0   : > { %v621_v0 = vadd.f32 %v1011_v28, %v616_v60 }
 0x1c1   : > { %1024 = vtanh.f32 %v620_v62 }
 0x1c2   : > { %1026 = vtanh.f32 %v621_v0 }
 0x1c3   : > { %1028 = vtanh.f32 %v618_v61 }
 0x1c4   : > { %1030 = vtanh.f32 %v619_v63 }
 0x1c7   : > { %v1025_v1 = vpop.eup %1024 }
 0x1c8   : > { %v1027_v2 = vpop.eup %1026  ;;  %660 = vmatpush.msrb.mxu0 %v1025_v1 }
 0x1c9   : > { %v1029_v4 = vpop.eup %1028  ;;  %683 = vmatpush.msrb.mxu1 %v1027_v2 }
 0x1ca   : > { %v1031_v5 = vpop.eup %1030  ;;  %661 = vmatpush.msrb.mxu0 %v1029_v4 }
 0x1cb   : > { %684 = vmatpush.msrb.mxu1 %v1031_v5  ;;  %947 = vmatmul.msk.f32.vlgmr.msrb.gmra.mxu0 %vm495_vm0, %v626_v3 }
 0x1cc   : > { %949 = vmatmul.msk.f32.vlgmr.msrb.gmra.mxu1 %vm495_vm0, %v626_v3 }
 0x1d3   : > { %948 = vmatmul.msk.f32.gmra.mxu0 %vm495_vm0, %v627_v6 }
 0x1d4   : > { %950 = vmatmul.msk.f32.gmra.mxu1 %vm495_vm0, %v627_v6 }
 0x248   : > { %v663_v7 = vpop.f32.mrf.mxu0 }
 0x249   : > { %v686_v8 = vpop.f32.mrf.mxu1  ;;  %v664_v12 = vadd.f32 %v663_v7, %v633_v9 }
 0x24a   : > { %v687_v15 = vadd.f32 %v686_v8, %v633_v9 }
 0x250   : > { %v666_v11 = vpop.f32.mrf.mxu0 }
 0x251   : > { %v667_v13 = vadd.f32 %v666_v11, %v638_v10  ;;  %v689_v14 = vpop.f32.mrf.mxu1 }
 0x252   : > { %v690_v16 = vadd.f32 %v689_v14, %v638_v10 }
 0x253   : > { %1032 = vtanh.f32 %v667_v13 }
 0x254   : > { %1034 = vtanh.f32 %v690_v16 }
 0x255   : > { %1036 = vtanh.f32 %v664_v12 }
 0x256   : > { %1038 = vtanh.f32 %v687_v15 }
 0x259   : > { %v1033_v17 = vpop.eup %1032 }
 0x25a   : > { %v1035_v18 = vpop.eup %1034  ;;  %730 = vmatpush.msrb.mxu2 %v1033_v17 }
 0x25b   : > { %v1037_v20 = vpop.eup %1036  ;;  %753 = vmatpush.msrb.mxu3 %v1035_v18 }
 0x25c   : > { %v1039_v21 = vpop.eup %1038  ;;  %731 = vmatpush.msrb.mxu2 %v1037_v20 }
 0x25d   : > { %754 = vmatpush.msrb.mxu3 %v1039_v21  ;;  %951 = vmatmul.msk.f32.vlgmr.msrb.gmra.mxu2 %vm495_vm0, %v696_v19 }
 0x25e   : > { %953 = vmatmul.msk.f32.vlgmr.msrb.gmra.mxu3 %vm495_vm0, %v696_v19 }
 0x265   : > { %952 = vmatmul.msk.f32.gmra.mxu2 %vm495_vm0, %v697_v22 }
 0x266   : > { %954 = vmatmul.msk.f32.gmra.mxu3 %vm495_vm0, %v697_v22 }
 0x2e0   : > { %v733_v23 = vpop.f32.mrf.mxu2 }
 0x2e1   : > { %v756_v24 = vpop.f32.mrf.mxu3  ;;  %v734_v26 = vadd.f32 %v733_v23, %v703_v25 }
 0x2e2   : > { %v757_v28 = vadd.f32 %v756_v24, %v703_v25 }
 0x2e3   : > { %v762_v33 = vadd.f32 %v1029_v4, %v734_v26 }
 0x2e4   : > { %v763_v35 = vadd.f32 %v1031_v5, %v757_v28 }
 0x2e8   : > { %v736_v29 = vpop.f32.mrf.mxu2 }
 0x2e9   : > { %v737_v30 = vadd.f32 %v736_v29, %v708_v27  ;;  %v759_v31 = vpop.f32.mrf.mxu3 }
 0x2ea   : > { %v760_v32 = vadd.f32 %v759_v31, %v708_v27 }
 0x2eb   : > { %v764_v34 = vadd.f32 %v1025_v1, %v737_v30 }
 0x2ec   : > { %v765_v36 = vadd.f32 %v1027_v2, %v760_v32 }
 0x2ed   : > { %1040 = vtanh.f32 %v764_v34 }
 0x2ee   : > { %1042 = vtanh.f32 %v765_v36 }
 0x2ef   : > { %1044 = vtanh.f32 %v762_v33 }
 0x2f0   : > { %1046 = vtanh.f32 %v763_v35 }
 0x2f3   : > { %v1041_v37 = vpop.eup %1040 }
 0x2f4   : > { %v1043_v38 = vpop.eup %1042  ;;  %794 = vmatpush.msra.mxu0 %v1041_v37 }
 0x2f5   : > { %v1045_v40 = vpop.eup %1044  ;;  %814 = vmatpush.msra.mxu1 %v1043_v38 }
 0x2f6   : > { %v1047_v41 = vpop.eup %1046  ;;  %795 = vmatpush.msra.mxu0 %v1045_v40 }
 0x2f7   : > { %815 = vmatpush.msra.mxu1 %v1047_v41  ;;  %955 = vmatmul.msk.f32.vlgmr.msra.gmra.mxu0 %vm495_vm0, %v770_v39 }
 0x2f8   : > { %956 = vmatmul.msk.f32.vlgmr.msra.gmra.mxu1 %vm495_vm0, %v770_v39 }
 0x374   : > { %v797_v43 = vpop.f32.mrf.mxu0 }
 0x375   : > { %v798_v44 = vadd.f32 %v797_v43, %v775_v42  ;;  %v817_v45 = vpop.f32.mrf.mxu1 }
 0x376   : > { %v818_v46 = vadd.f32 %v817_v45, %v775_v42 }
 0x377   : > { %v957_v47 = vmul.f32 -1.442695, %v798_v44 }
 0x378   : > { %v958_v48 = vmul.f32 -1.442695, %v818_v46 }
 0x379   : > { %1048 = vpow2.f32 %v957_v47 }
 0x37a   : > { %1050 = vpow2.f32 %v958_v48 }
 0x37f   : > { %v1049_v49 = vpop.eup %1048 }
 0x380   : > { %v1051_v50 = vpop.eup %1050  ;;  %v826_v51 = vadd.f32 1.0, %v1049_v49 }
 0x381   : > { %v827_v52 = vadd.f32 1.0, %v1051_v50 }
 0x382   : > { %1052 = vrcp.f32 %v826_v51  ;;  %v839_v59 = vand.u32 2147483648, %v826_v51  ;;  %v837_v61 = vand.u32 2147483647, %v826_v51  ;;  %vm833_vm3 = vweird.f32 %v826_v51 }
 0x383   : > { %1054 = vrcp.f32 %v827_v52  ;;  %v854_v62 = vand.u32 2147483648, %v827_v52  ;;  %v852_v0 = vand.u32 2147483647, %v827_v52  ;;  %vm848_vm5 = vweird.f32 %v827_v52 }
 0x384   : > { %v840_v2 = vor.u32 1.1754944e-38, %v839_v59  ;;  %vm838_vm6 = vcmp.eq.f32.partialorder %v837_v61, 8.507059e+37 }
 0x385   : > { %v855_v5 = vor.u32 1.1754944e-38, %v854_v62  ;;  %vm853_vm8 = vcmp.eq.f32.partialorder %v852_v0, 8.507059e+37 }
 0x388   : > { %v1053_v53 = vpop.eup %1052 }
 0x389   : > { %v1055_v54 = vpop.eup %1054  ;;  %v829_v55 = vmul.f32 %v1053_v53, %v826_v51  ;;  %vm834_vm1 = vweird.f32 %v1053_v53 }
 0x38a   : > { %v844_v56 = vmul.f32 %v1055_v54, %v827_v52  ;;  %vm849_vm2 = vweird.f32 %v1055_v54  ;;  %vm835_vm4 = vmor %vm833_vm3, %vm834_vm1 }
 0x38b   : > { %v830_v57 = vsub.f32 1.0, %v829_v55  ;;  %vm850_vm7 = vmor %vm848_vm5, %vm849_vm2 }
 0x38c   : > { %v845_v58 = vsub.f32 1.0, %v844_v56 }
 0x38d   : > { %v831_v60 = vmul.f32 %v1053_v53, %v830_v57 }
 0x38e   : > { %v846_v63 = vmul.f32 %v1055_v54, %v845_v58 }
 0x38f   : > { %v832_v1 = vadd.f32 %v1053_v53, %v831_v60 }
 0x390   : > { %v847_v3 = vadd.f32 %v1055_v54, %v846_v63 }
 0x391   : > { %v836_v4 = vsel %vm835_vm4, %v1053_v53, %v832_v1 }
 0x392   : > { %v841_v6 = vsel %vm838_vm6, %v840_v2, %v836_v4  ;;  %v851_v7 = vsel %vm850_vm7, %v1055_v54, %v847_v3 }
 0x393   : > { %v856_v8 = vsel %vm853_vm8, %v855_v5, %v851_v7  ;;  %858 = vst [vmem:[%s432_s24] sm:$0xff] %v841_v6 }
 0x394   : > { %859 = vst [vmem:[%s432_s24 + $0x8] sm:$0xff] %v856_v8 }
 0x395   : > { %1083 = shalt.err (!%p1080_p3)
}
 0x396   : > { %965 = dma.vmem_to_hbm [thread:$0]  (%p1229_p5), %s875_s30, 256, %s877_s29, %s861_s15  }
 0x397 PF: > { %p971_p4 = scmp.ge.s32.totalorder %s1118_s28, 2  ;;  %s888_s20 = sand.u32 1, %s1106_s25  }
 0x398   : > { %s889_s24 = scalar_lea.sflag [#allocation3], %s888_s20 }
 0x399   : > { %p968_p7 = pnand %p971_p4, %p1233_p6 }
 0x39b   : > { %p969_p8 = pneg %p968_p7 }
 0x39d   : > { %1101 = dma.done.wait (%p969_p8), %s889_s24, 256  }
 0x39e   : > { %1103 = vsyncadd (%p969_p8), %s889_s24, 4294967040  ;;  %s1384_s0 = sld [smem:[#allocation5_spill]]  ;;  %p23_p9 = scmp.ge.s32.totalorder %s1216_s14, 4  }
 0x39f   : > { %s1385_s27 = sld [smem:[#allocation6_spill]]  ;;  %s1386_s25 = smov %s1110_s26 }
 0x3a0   : > { %s1388_s28 = smov %s1216_s14  ;;  %25 = sbr.rel (!%p23_p9) target bundleno = 5 (0x5), region = 107 }
 0x3a4   : > { %s1387_s26 = smov %s1384_s0 }
 0x3a5   :  { %895 = vsyncpa [#allocation3], 1 }
 0x3a6   :  { %897 = vsyncpa [#allocation3 + $0x1], 1 }

</bundles_post_ra>
